<compile_context>
chip_gen: v7x
topology: tpu7x:2x2x1
jax: 0.10.0
libtpu: 0.0.40
codegen_flags: <defaults>
</compile_context>

<pallas_src>
import jax
import jax.numpy as jnp
from jax.experimental import pallas as pl
from jax.experimental.pallas import tpu as pltpu

LANE = 128  # TPU lane width; the hidden dim is padded to this (one-time, exact).


def _round_up(n, m):
    return ((n + m - 1) // m) * m


def _pad_axis(a, axis, target, value=0.0):
    pad = target - a.shape[axis]
    if pad <= 0:
        return a
    widths = [(0, 0)] * a.ndim
    widths[axis] = (0, pad)
    return jnp.pad(a, widths, constant_values=value)


def _num_tensorcores_per_chip():
    """Best-effort detection of 2-TC chips (v7x). Falls back to 1."""
    try:
        kind = jax.devices()[0].device_kind.lower()
        return 2 if ("v7" in kind or "7x" in kind) else 1
    except Exception:
        return 1


def _choose_tile_b(B, cores):
    """Batch-tile selection: big tiles to amortize the ~0.35us per-step overhead,
    but at least `cores` parallel tiles on multi-TC chips for medium+ batches."""
    CAP = 2048
    if B <= CAP:
        tb = B
        if cores > 1 and B >= 256 and B % (8 * cores) == 0:
            tb = B // cores  # let megacore shard the "parallel" grid axis
        return tb
    # Large batch: biggest multiple-of-8 divisor of B not exceeding CAP.
    for cand in range(CAP, 7, -8):
        if B % cand == 0:
            return cand
    # TODO(synk): handle ragged batches with pl.cdiv + a masked final tile instead
    # of falling back to one giant tile.
    return B


def mlp_kernel(x_ref, w1_ref, b1_ref, w2_ref, b2_ref, w3_ref, b3_ref, o_ref):
    # Cast x in-kernel to the matmul operand dtype (bf16 by default); avoids an
    # extra wrapper-side cast pass over x in HBM.
    x = x_ref[...].astype(w1_ref.dtype)

    # Layer 1: Linear + ReLU (MXU matmul, f32 accumulation).
    h1 = jnp.dot(x, w1_ref[...], preferred_element_type=jnp.float32) + b1_ref[...]
    h1 = jnp.maximum(h1, 0.0)

    # Layer 2: Linear + ReLU.
    h2 = jnp.dot(h1.astype(w2_ref.dtype), w2_ref[...],
                 preferred_element_type=jnp.float32) + b2_ref[...]
    h2 = jnp.maximum(h2, 0.0)

    # Layer 3: Linear (unpadded out_dim columns).
    logits = jnp.dot(h2.astype(w3_ref.dtype), w3_ref[...],
                     preferred_element_type=jnp.float32) + b3_ref[...]

    # Numerically stable softmax, all in f32.
    m = jnp.max(logits, axis=-1, keepdims=True)
    e = jnp.exp(logits - m)
    denom = jnp.sum(e, axis=-1, keepdims=True)
    o_ref[...] = (e * pl.reciprocal(denom, approx=False)).astype(o_ref.dtype)


def prepare_params(params, weights_dtype=jnp.bfloat16):
    """One-time parameter layout plumbing (call once at init, reuse every forward):
      * pad the hidden dim to 128 lanes with zeros (exact: zero rows/cols + ReLU
        contribute nothing),
      * cast matmul operands to `weights_dtype` (bf16 default; f32 MXU is
        multi-pass on all TPU gens),
      * keep biases in f32.
    Input/output feature dims are NOT padded (blocks use full array extents)."""
    hid = params["w1"].shape[1]
    hid_p = _round_up(hid, LANE)
    w1 = _pad_axis(params["w1"], 1, hid_p).astype(weights_dtype)
    b1 = _pad_axis(params["b1"], 1, hid_p).astype(jnp.float32)
    w2 = _pad_axis(_pad_axis(params["w2"], 0, hid_p), 1, hid_p).astype(weights_dtype)
    b2 = _pad_axis(params["b2"], 1, hid_p).astype(jnp.float32)
    w3 = _pad_axis(params["w3"], 0, hid_p).astype(weights_dtype)
    b3 = params["b3"].astype(jnp.float32)
    return {"w1": w1, "b1": b1, "w2": w2, "b2": b2, "w3": w3, "b3": b3}


def mlp_forward(x, prepared, *, tile_b=None):
    """x: (B, input_dim) float32. prepared: output of prepare_params()."""
    w1, b1 = prepared["w1"], prepared["b1"]
    w2, b2 = prepared["w2"], prepared["b2"]
    w3, b3 = prepared["w3"], prepared["b3"]

    B, in_dim = x.shape
    hid_p = w1.shape[1]
    out_dim = w3.shape[1]
    assert w1.shape[0] == in_dim, "input_dim mismatch between x and params"

    cores = _num_tensorcores_per_chip()
    if tile_b is None:
        tile_b = _choose_tile_b(B, cores)
    assert B % tile_b == 0, "batch must be divisible by tile_b"
    num_tiles = B // tile_b

    # Weights/biases: constant block index -> fetched once, VMEM-resident across
    # all grid steps (no re-DMA); their VMEM footprint here is tiny (<0.5 MiB).
    def w_spec(shape):
        return pl.BlockSpec(shape, lambda i: (0, 0))

    # Advisory cost hint so XLA schedules surrounding ops around the kernel.
    flops = 2 * B * (in_dim * hid_p + hid_p * hid_p + hid_p * out_dim)
    bytes_accessed = (
        int(x.size) * x.dtype.itemsize
        + sum(int(a.size) * a.dtype.itemsize for a in (w1, b1, w2, b2, w3, b3))
        + B * out_dim * 4
    )
    cost = pl.CostEstimate(flops=int(flops),
                           transcendentals=int(B * out_dim),
                           bytes_accessed=int(bytes_accessed))

    # NOTE(v7x): VMEM is 64 MiB per TC; with tile_b <= 2048 and these feature
    # sizes the double-buffered x/out tiles plus weights are well under 1 MiB.
    out = pl.pallas_call(
        mlp_kernel,
        out_shape=jax.ShapeDtypeStruct((B, out_dim), jnp.float32),
        grid_spec=pl.GridSpec(
            grid=(num_tiles,),
            in_specs=[
                pl.BlockSpec((tile_b, in_dim), lambda i: (i, 0)),  # x tile (unpadded)
                w_spec((in_dim, hid_p)),   # w1
                w_spec((1, hid_p)),        # b1
                w_spec((hid_p, hid_p)),    # w2
                w_spec((1, hid_p)),        # b2
                w_spec((hid_p, out_dim)),  # w3 (unpadded out columns)
                w_spec((1, out_dim)),      # b3
            ],
            out_specs=pl.BlockSpec((tile_b, out_dim), lambda i: (i, 0)),
        ),
        compiler_params=pltpu.CompilerParams(
            dimension_semantics=("parallel",),
            # Above v5e's 16 MiB scoped default; plenty for tile_b up to 2048.
            vmem_limit_bytes=32 * 1024 * 1024,
        ),
        cost_estimate=cost,
    )(x, w1, b1, w2, b2, w3, b3)

    return out


def init_params(key, input_dim, output_dim, hidden_dim=32):
    """Deterministic init mimicking PyTorch Linear default
    (U[-1/sqrt(fan_in), 1/sqrt(fan_in)]). Weights stored pre-transposed as
    (in, out); biases as (1, out)."""
    def linear(k, fan_in, fan_out):
        kw, kb = jax.random.split(k)
        bound = 1.0 / jnp.sqrt(fan_in)
        w = jax.random.uniform(kw, (fan_in, fan_out), jnp.float32, -bound, bound)
        b = jax.random.uniform(kb, (1, fan_out), jnp.float32, -bound, bound)
        return w, b

    k1, k2, k3 = jax.random.split(key, 3)
    w1, b1 = linear(k1, input_dim, hidden_dim)
    w2, b2 = linear(k2, hidden_dim, hidden_dim)
    w3, b3 = linear(k3, hidden_dim, output_dim)
    return {"w1": w1, "b1": b1, "w2": w2, "b2": b2, "w3": w3, "b3": b3}


def mlp_reference(x, p):
    h1 = jnp.maximum(x @ p["w1"] + p["b1"], 0.0)
    h2 = jnp.maximum(h1 @ p["w2"] + p["b2"], 0.0)
    logits = h2 @ p["w3"] + p["b3"]
    return jax.nn.softmax(logits, axis=-1)


if __name__ == "__main__":
    key = jax.random.PRNGKey(0)
    k_x, k_x2, k_p = jax.random.split(key, 3)

    batch, input_dim, hidden_dim, output_dim = 16, 16, 32, 8
    x = jax.random.normal(k_x, (batch, input_dim), jnp.float32)
    params = init_params(k_p, input_dim, output_dim, hidden_dim)
    ref = mlp_reference(x, params)

    # --- f32 operand path: exact vs. the f32 reference (single grid step) -----
    prep_f32 = prepare_params(params, weights_dtype=jnp.float32)
    out_f32 = jax.block_until_ready(mlp_forward(x, prep_f32))
    assert out_f32.shape == (batch, output_dim)
    assert jnp.allclose(out_f32, ref, atol=1e-5, rtol=1e-5), "f32 mismatch vs reference"
    assert jnp.allclose(jnp.sum(out_f32, axis=-1), 1.0, atol=1e-5)

    # --- default bf16 operand path (f32 accumulation/softmax): looser check ---
    prep_bf16 = prepare_params(params)  # bfloat16 matmul operands by default
    out_bf16 = jax.block_until_ready(mlp_forward(x, prep_bf16))
    assert out_bf16.shape == (batch, output_dim)
    assert jnp.allclose(out_bf16, ref, atol=3e-2, rtol=3e-2), "bf16 mismatch vs reference"
    assert jnp.allclose(jnp.sum(out_bf16, axis=-1), 1.0, atol=1e-3)

    # --- multi-tile (grid > 1) path: f32 operands, forced 128-row tiles -------
    B2 = 512
    x2 = jax.random.normal(k_x2, (B2, input_dim), jnp.float32)
    ref2 = mlp_reference(x2, params)
    out2 = jax.block_until_ready(mlp_forward(x2, prep_f32, tile_b=128))
    assert out2.shape == (B2, output_dim)
    assert jnp.allclose(out2, ref2, atol=1e-5, rtol=1e-5), "tiled f32 mismatch vs reference"
    assert jnp.allclose(jnp.sum(out2, axis=-1), 1.0, atol=1e-5)

    print("KERNEL_OK")
</pallas_src>

<mosaic_0001>
module attributes {stable_mosaic.version = 11 : i64} {
  func.func @mlp_kernel(%arg0: i32, %arg1: memref<16x16xf32, #tpu.memory_space<vmem>>, %arg2: memref<16x128xf32, #tpu.memory_space<vmem>>, %arg3: memref<1x128xf32, #tpu.memory_space<vmem>>, %arg4: memref<128x128xf32, #tpu.memory_space<vmem>>, %arg5: memref<1x128xf32, #tpu.memory_space<vmem>>, %arg6: memref<128x8xf32, #tpu.memory_space<vmem>>, %arg7: memref<1x8xf32, #tpu.memory_space<vmem>>, %arg8: memref<16x8xf32, #tpu.memory_space<vmem>>) attributes {dimension_semantics = [#tpu.dimension_semantics<parallel>], iteration_bounds = array<i64: 1>, scalar_prefetch = 0 : i64, scratch_operands = 0 : i64, tpu.core_type = #tpu.core_type<tc>, window_params = [{transform_indices = @transform_0, window_bounds = array<i64: 16, 16>}, {pipeline_mode = #tpu.pipeline_mode<synchronous>, transform_indices = @transform_1, window_bounds = array<i64: 16, 128>}, {pipeline_mode = #tpu.pipeline_mode<synchronous>, transform_indices = @transform_2, window_bounds = array<i64: 1, 128>}, {pipeline_mode = #tpu.pipeline_mode<synchronous>, transform_indices = @transform_3, window_bounds = array<i64: 128, 128>}, {pipeline_mode = #tpu.pipeline_mode<synchronous>, transform_indices = @transform_4, window_bounds = array<i64: 1, 128>}, {pipeline_mode = #tpu.pipeline_mode<synchronous>, transform_indices = @transform_5, window_bounds = array<i64: 128, 8>}, {pipeline_mode = #tpu.pipeline_mode<synchronous>, transform_indices = @transform_6, window_bounds = array<i64: 1, 8>}, {transform_indices = @transform_7, window_bounds = array<i64: 16, 8>}]} {
    %c0 = arith.constant 0 : index
    %c0_0 = arith.constant 0 : index
    %0 = vector.load %arg1[%c0, %c0_0] : memref<16x16xf32, #tpu.memory_space<vmem>>, vector<16x16xf32>
    %c0_1 = arith.constant 0 : index
    %c0_2 = arith.constant 0 : index
    %1 = vector.load %arg2[%c0_1, %c0_2] : memref<16x128xf32, #tpu.memory_space<vmem>>, vector<16x128xf32>
    %cst = arith.constant dense<0.000000e+00> : vector<16x128xf32>
    %2 = tpu.matmul %0, %1, %cst {dimension_numbers = #tpu.dot_dimension_numbers<[1], [0], [0], [1], [0, 0, 1, 1], [], []>} : vector<16x16xf32>, vector<16x128xf32>, vector<16x128xf32> -> vector<16x128xf32>
    %c0_3 = arith.constant 0 : index
    %c0_4 = arith.constant 0 : index
    %3 = vector.load %arg3[%c0_3, %c0_4] : memref<1x128xf32, #tpu.memory_space<vmem>>, vector<1x128xf32>
    %4 = vector.broadcast %3 : vector<1x128xf32> to vector<16x128xf32>
    %5 = arith.addf %2, %4 : vector<16x128xf32>
    %cst_5 = arith.constant 0.000000e+00 : f32
    %6 = vector.broadcast %cst_5 : f32 to vector<16x128xf32>
    %7 = arith.maximumf %5, %6 : vector<16x128xf32>
    %c0_6 = arith.constant 0 : index
    %c0_7 = arith.constant 0 : index
    %8 = vector.load %arg4[%c0_6, %c0_7] : memref<128x128xf32, #tpu.memory_space<vmem>>, vector<128x128xf32>
    %cst_8 = arith.constant dense<0.000000e+00> : vector<16x128xf32>
    %9 = tpu.matmul %7, %8, %cst_8 {dimension_numbers = #tpu.dot_dimension_numbers<[1], [0], [0], [1], [0, 0, 1, 1], [], []>} : vector<16x128xf32>, vector<128x128xf32>, vector<16x128xf32> -> vector<16x128xf32>
    %c0_9 = arith.constant 0 : index
    %c0_10 = arith.constant 0 : index
    %10 = vector.load %arg5[%c0_9, %c0_10] : memref<1x128xf32, #tpu.memory_space<vmem>>, vector<1x128xf32>
    %11 = vector.broadcast %10 : vector<1x128xf32> to vector<16x128xf32>
    %12 = arith.addf %9, %11 : vector<16x128xf32>
    %cst_11 = arith.constant 0.000000e+00 : f32
    %13 = vector.broadcast %cst_11 : f32 to vector<16x128xf32>
    %14 = arith.maximumf %12, %13 : vector<16x128xf32>
    %c0_12 = arith.constant 0 : index
    %c0_13 = arith.constant 0 : index
    %15 = vector.load %arg6[%c0_12, %c0_13] : memref<128x8xf32, #tpu.memory_space<vmem>>, vector<128x8xf32>
    %cst_14 = arith.constant dense<0.000000e+00> : vector<16x8xf32>
    %16 = tpu.matmul %14, %15, %cst_14 {dimension_numbers = #tpu.dot_dimension_numbers<[1], [0], [0], [1], [0, 0, 1, 1], [], []>} : vector<16x128xf32>, vector<128x8xf32>, vector<16x8xf32> -> vector<16x8xf32>
    %c0_15 = arith.constant 0 : index
    %c0_16 = arith.constant 0 : index
    %17 = vector.load %arg7[%c0_15, %c0_16] : memref<1x8xf32, #tpu.memory_space<vmem>>, vector<1x8xf32>
    %18 = vector.broadcast %17 : vector<1x8xf32> to vector<16x8xf32>
    %19 = arith.addf %16, %18 : vector<16x8xf32>
    %cst_17 = arith.constant dense<0xFF800000> : vector<16xf32>
    %20 = vector.multi_reduction <maximumf>, %19, %cst_17 [1] : vector<16x8xf32> to vector<16xf32>
    %21 = vector.shape_cast %20 : vector<16xf32> to vector<16x1xf32>
    %22 = vector.broadcast %21 : vector<16x1xf32> to vector<16x8xf32>
    %23 = arith.subf %19, %22 : vector<16x8xf32>
    %24 = math.exp %23 : vector<16x8xf32>
    %cst_18 = arith.constant dense<0.000000e+00> : vector<16xf32>
    %25 = vector.multi_reduction <add>, %24, %cst_18 [1] : vector<16x8xf32> to vector<16xf32>
    %26 = vector.shape_cast %25 : vector<16xf32> to vector<16x1xf32>
    %27 = tpu.reciprocal %26 : vector<16x1xf32> -> vector<16x1xf32>
    %28 = vector.broadcast %27 : vector<16x1xf32> to vector<16x8xf32>
    %29 = arith.mulf %24, %28 : vector<16x8xf32>
    %c0_19 = arith.constant 0 : index
    %c0_20 = arith.constant 0 : index
    %30 = vector.load %arg8[%c0_19, %c0_20] : memref<16x8xf32, #tpu.memory_space<vmem>>, vector<16x8xf32>
    tpu.vector_store %arg8[%c0_19, %c0_20], %29 {strides = array<i32>} : memref<16x8xf32, #tpu.memory_space<vmem>>, vector<16x8xf32>,
    return
  }
  func.func @transform_0(%arg0: i32) -> (i32, i32) {
    %c0_i32 = arith.constant 0 : i32
    %c0_i32_0 = arith.constant 0 : i32
    return %arg0, %c0_i32 : i32, i32
  }
  func.func @transform_1(%arg0: i32) -> (i32, i32) {
    %c0_i32 = arith.constant 0 : i32
    %c0_i32_0 = arith.constant 0 : i32
    %c0_i32_1 = arith.constant 0 : i32
    return %c0_i32, %c0_i32_0 : i32, i32
  }
  func.func @transform_2(%arg0: i32) -> (i32, i32) {
    %c0_i32 = arith.constant 0 : i32
    %c0_i32_0 = arith.constant 0 : i32
    %c0_i32_1 = arith.constant 0 : i32
    return %c0_i32, %c0_i32_0 : i32, i32
  }
  func.func @transform_3(%arg0: i32) -> (i32, i32) {
    %c0_i32 = arith.constant 0 : i32
    %c0_i32_0 = arith.constant 0 : i32
    %c0_i32_1 = arith.constant 0 : i32
    return %c0_i32, %c0_i32_0 : i32, i32
  }
  func.func @transform_4(%arg0: i32) -> (i32, i32) {
    %c0_i32 = arith.constant 0 : i32
    %c0_i32_0 = arith.constant 0 : i32
    %c0_i32_1 = arith.constant 0 : i32
    return %c0_i32, %c0_i32_0 : i32, i32
  }
  func.func @transform_5(%arg0: i32) -> (i32, i32) {
    %c0_i32 = arith.constant 0 : i32
    %c0_i32_0 = arith.constant 0 : i32
    %c0_i32_1 = arith.constant 0 : i32
    return %c0_i32, %c0_i32_0 : i32, i32
  }
  func.func @transform_6(%arg0: i32) -> (i32, i32) {
    %c0_i32 = arith.constant 0 : i32
    %c0_i32_0 = arith.constant 0 : i32
    %c0_i32_1 = arith.constant 0 : i32
    return %c0_i32, %c0_i32_0 : i32, i32
  }
  func.func @transform_7(%arg0: i32) -> (i32, i32) {
    %c0_i32 = arith.constant 0 : i32
    %c0_i32_0 = arith.constant 0 : i32
    return %arg0, %c0_i32 : i32, i32
  }
}

</mosaic_0001>

<bundles_post_ra>
// kernel: tpu_custom_call.1
= control target key start
LH: loop header
LB: loop body
LE: loop exit
PB: predicated region body
PF: predicated region fallthrough
CT: control target
= control target key end

     0   :  { %12 = vsyncpa [#allocation3], 0  ;;  %s588_s24 = smov [#allocation2]   ;;  %s768_s0 = inlined_call_operand.vmem [shape: f32[16,16], index: 0, kind: input, shape index: {}]   ;;  %s769_s1 = inlined_call_operand.hbm [shape: f32[16,128], index: 1, kind: input, shape index: {}]   ;;  %s770_s2 = inlined_call_operand.vmem [shape: f32[1,128], index: 2, kind: input, shape index: {}]   ;;  %s771_s3 = inlined_call_operand.vmem [shape: f32[128,128], index: 3, kind: input, shape index: {}]   ;;  %s772_s4 = inlined_call_operand.vmem [shape: f32[1,128], index: 4, kind: input, shape index: {}]   ;;  %s773_s5 = inlined_call_operand.vmem [shape: f32[128,8], index: 5, kind: input, shape index: {}]   ;;  %s774_s6 = inlined_call_operand.vmem [shape: f32[1,8], index: 6, kind: input, shape index: {}]   ;;  %s775_s7 = inlined_call_operand.vmem [shape: f32[16,8], index: 7, kind: output, shape index: {}]  }
   0x1   :  { %s20_s25 = sshll.u32 %s588_s24, 4  ;;  %s564_s28 = scalar_lea.hbm %s769_s1, 256  ;;  %s21_s25 = int_to_ptr.vmem [resolvable:$true] %s20_s25 }
   0x2   :  { %p565_p0 = scmp.ne.s32.totalorder %s769_s1, %s564_s28  ;;  %p568_p1 = scmp.lt.u32.totalorder %s564_s28, %s769_s1 }
   0x4   :  { %p570_p2 = pnand %p568_p1, %p565_p0 }
   0x6   :  { %573 = shalt.err (!%p570_p2)
}
   0x7   :  { %s574_s10 = scalar_lea.vmem %s21_s25, 256  ;;  %p579_p4 = scmp.lt.s32.totalorder %s21_s25, %s21_s25 }
   0x8   :  { %p575_p3 = scmp.ne.s32.totalorder %s21_s25, %s574_s10  ;;  %p580_p5 = scmp.lt.s32.totalorder %s574_s10, %s574_s10 }
   0xa   :  { %p581_p6 = por %p580_p5, %p579_p4 }
   0xc   :  { %p582_p7 = pnand %p581_p6, %p575_p3 }
   0xe   :  { %585 = shalt.err (!%p582_p7)
}
   0xf   :  { %s589_s11 = smov 128   ;;  %s590_s12 = smov 8  }
  0x10   :  { %26 = dma.hbm_to_vmem [thread:$0]  %s769_s1, 256, %s21_s25, [#allocation3], %s589_s11, %s589_s11, %s590_s12  }
  0x11   :  { %586 = dma.done.wait [#allocation3], 256  }
  0x12   :  { %587 = vsyncadd [#allocation3], 4294967040  ;;  %vm51_vm0 = vcmask 130048   ;;  %v42_v0 = vld [vmem:[#allocation2] sm:$0xff]  ;;  %v43_v1 = vld [vmem:[#allocation2 + $0x8] sm:$0xff]  ;;  %vm333_vm1 = vcmask 64512  }
  0x13   :  { %v40_v2 = vld [vmem:[%s768_s0] sm:$0xff]  ;;  %v485_v3 = vpack.c.bf16 %v43_v1, %v42_v0  ;;  %v136_v5 = vld [vmem:[%s771_s3 + $0x8] sm:$0xff]  ;;  %v137_v7 = vld [vmem:[%s771_s3 + $0x10] sm:$0xff] }
  0x14   :  { %412 = vmatprep.mubr.msk.f32.mxu0 %vm51_vm0, %v40_v2  ;;  %v135_v4 = vld [vmem:[%s771_s3] sm:$0xff]  ;;  %v138_v8 = vld [vmem:[%s771_s3 + $0x18] sm:$0xff]  ;;  %v140_v11 = vld [vmem:[%s771_s3 + $0x28] sm:$0xff] }
  0x15   :  { %v489_v6 = vpack.c.bf16 %v136_v5, %v135_v4  ;;  %486 = vmatprep.subr.bf16.mxu0 %v485_v3  ;;  %v493_v9 = vpack.c.bf16 %v138_v8, %v137_v7  ;;  %v139_v10 = vld [vmem:[%s771_s3 + $0x20] sm:$0xff]  ;;  %v41_v12 = vld [vmem:[%s768_s0 + $0x8] sm:$0xff]  ;;  %v141_v14 = vld [vmem:[%s771_s3 + $0x30] sm:$0xff] }
  0x16   :  { %488 = vmatpush3.bf16.msra.mxu0 %v485_v3  ;;  %v497_v13 = vpack.c.bf16 %v140_v11, %v139_v10  ;;  %v142_v15 = vld [vmem:[%s771_s3 + $0x38] sm:$0xff]  ;;  %v143_v17 = vld [vmem:[%s771_s3 + $0x40] sm:$0xff]  ;;  %v144_v18 = vld [vmem:[%s771_s3 + $0x48] sm:$0xff] }
  0x17   :  { %490 = vmatprep.subr.bf16.mxu1 %v489_v6  ;;  %v501_v16 = vpack.c.bf16 %v142_v15, %v141_v14  ;;  %v505_v19 = vpack.c.bf16 %v144_v18, %v143_v17  ;;  %v145_v20 = vld [vmem:[%s771_s3 + $0x50] sm:$0xff]  ;;  %v146_v21 = vld [vmem:[%s771_s3 + $0x58] sm:$0xff]  ;;  %v147_v23 = vld [vmem:[%s771_s3 + $0x60] sm:$0xff] }
  0x18   :  { %492 = vmatpush3.bf16.msra.mxu1 %v489_v6  ;;  %v509_v22 = vpack.c.bf16 %v146_v21, %v145_v20  ;;  %v148_v24 = vld [vmem:[%s771_s3 + $0x68] sm:$0xff]  ;;  %v149_v26 = vld [vmem:[%s771_s3 + $0x70] sm:$0xff]  ;;  %v150_v27 = vld [vmem:[%s771_s3 + $0x78] sm:$0xff] }
  0x19   :  { %494 = vmatprep.subr.bf16.mxu1 %v493_v9  ;;  %413 = vmatmul.mubr.msk.f32.vlgmr.msra.gmra.mrb[0].mxu0 %vm51_vm0, %v41_v12  ;;  %v513_v25 = vpack.c.bf16 %v148_v24, %v147_v23  ;;  %v517_v28 = vpack.c.bf16 %v150_v27, %v149_v26  ;;  %v235_v29 = vld [vmem:[%s773_s5] sm:$0xff]  ;;  %v236_v30 = vld [vmem:[%s773_s5 + $0x8] sm:$0xff]  ;;  %v237_v31 = vld [vmem:[%s773_s5 + $0x10] sm:$0xff] }
  0x1a   :  { %v521_v32 = vpack.c.bf16 %v236_v30, %v235_v29  ;;  %v238_v33 = vld [vmem:[%s773_s5 + $0x18] sm:$0xff]  ;;  %v239_v35 = vld [vmem:[%s773_s5 + $0x20] sm:$0xff]  ;;  %v240_v36 = vld [vmem:[%s773_s5 + $0x28] sm:$0xff] }
  0x1b   :  { %v525_v34 = vpack.c.bf16 %v238_v33, %v237_v31  ;;  %v529_v37 = vpack.c.bf16 %v240_v36, %v239_v35  ;;  %v241_v38 = vld [vmem:[%s773_s5 + $0x30] sm:$0xff]  ;;  %v242_v39 = vld [vmem:[%s773_s5 + $0x38] sm:$0xff]  ;;  %v243_v41 = vld [vmem:[%s773_s5 + $0x40] sm:$0xff] }
  0x1c   :  { %496 = vmatpush3.bf16.msra.mxu1 %v493_v9  ;;  %522 = vmatprep.subr.bf16.mxu0 %v521_v32  ;;  %v533_v40 = vpack.c.bf16 %v242_v39, %v241_v38  ;;  %v244_v42 = vld [vmem:[%s773_s5 + $0x48] sm:$0xff]  ;;  %v245_v44 = vld [vmem:[%s773_s5 + $0x50] sm:$0xff]  ;;  %v246_v45 = vld [vmem:[%s773_s5 + $0x58] sm:$0xff] }
  0x1d   :  { %498 = vmatprep.subr.bf16.mxu1 %v497_v13  ;;  %524 = vmatpush3.bf16.msra.mxu0 %v521_v32  ;;  %v537_v43 = vpack.c.bf16 %v244_v42, %v243_v41  ;;  %v541_v46 = vpack.c.bf16 %v246_v45, %v245_v44  ;;  %v247_v47 = vld [vmem:[%s773_s5 + $0x60] sm:$0xff]  ;;  %v248_v48 = vld [vmem:[%s773_s5 + $0x68] sm:$0xff]  ;;  %v249_v57 = vld [vmem:[%s773_s5 + $0x70] sm:$0xff] }
  0x1e   :  { %526 = vmatprep.subr.bf16.mxu0 %v525_v34  ;;  %v545_v49 = vpack.c.bf16 %v248_v48, %v247_v47  ;;  %v363_v50 = vld [vmem:[%s770_s2] ss:$0 sm:$0xff]  ;;  %v250_v58 = vld [vmem:[%s773_s5 + $0x78] sm:$0xff] }
  0x1f   :  { %v549_v59 = vpack.c.bf16 %v250_v58, %v249_v57  ;;  %v366_v60 = vld [vmem:[%s772_s4] ss:$0 sm:$0xff] }
  0x20   :  { %500 = vmatpush3.bf16.msra.mxu1 %v497_v13  ;;  %v367_v3 = vld [vmem:[%s774_s6] ss:$0 sm:$0xff] }
  0x21   :  { %502 = vmatprep.subr.bf16.mxu1 %v501_v16  ;;  %528 = vmatpush3.bf16.msra.mxu0 %v525_v34 }
  0x22   :  { %530 = vmatprep.subr.bf16.mxu0 %v529_v37 }
  0x24   :  { %504 = vmatpush3.bf16.msra.mxu1 %v501_v16 }
  0x25   :  { %506 = vmatprep.subr.bf16.mxu1 %v505_v19  ;;  %532 = vmatpush3.bf16.msra.mxu0 %v529_v37 }
  0x26   :  { %534 = vmatprep.subr.bf16.mxu0 %v533_v40 }
  0x28   :  { %508 = vmatpush3.bf16.msra.mxu1 %v505_v19 }
  0x29   :  { %510 = vmatprep.subr.bf16.mxu1 %v509_v22  ;;  %536 = vmatpush3.bf16.msra.mxu0 %v533_v40 }
  0x2a   :  { %538 = vmatprep.subr.bf16.mxu0 %v537_v43 }
  0x2c   :  { %512 = vmatpush3.bf16.msra.mxu1 %v509_v22 }
  0x2d   :  { %514 = vmatprep.subr.bf16.mxu1 %v513_v25  ;;  %540 = vmatpush3.bf16.msra.mxu0 %v537_v43 }
  0x2e   :  { %542 = vmatprep.subr.bf16.mxu0 %v541_v46 }
  0x30   :  { %516 = vmatpush3.bf16.msra.mxu1 %v513_v25 }
  0x31   :  { %518 = vmatprep.subr.bf16.mxu1 %v517_v28  ;;  %544 = vmatpush3.bf16.msra.mxu0 %v541_v46 }
  0x32   :  { %546 = vmatprep.subr.bf16.mxu0 %v545_v49 }
  0x34   :  { %520 = vmatpush3.bf16.msra.mxu1 %v517_v28 }
  0x35   :  { %548 = vmatpush3.bf16.msra.mxu0 %v545_v49 }
  0x36   :  { %550 = vmatprep.subr.bf16.mxu0 %v549_v59 }
  0x39   :  { %552 = vmatpush3.bf16.msra.mxu0 %v549_v59 }
  0xec   :  { %v414_v51 = vpop.f32.mrb[0].mxu0 }
  0xed   :  { %v130_v52 = vadd.f32 %v414_v51, %v363_v50  ;;  %v124_v53 = vpop.f32.mrb[1].mxu0 }
  0xee   :  { %v125_v54 = vadd.f32 %v363_v50, %v124_v53 }
  0xef   :  { %v134_v56 = vmax.f32 %v130_v52, 0.0 }
  0xf0   :  { %v133_v55 = vmax.f32 %v125_v54, 0.0 }
  0xf2   :  { %447 = vmatprep.mubr.f32.mxu1 %v133_v55 }
  0xf3   :  { %448 = vmatmul.mubr.f32.vlgmr.msra.gmra.mrb[0].mxu1 %v134_v56 }
 0x1c6   :  { %v449_v61 = vpop.f32.mrb[0].mxu1 }
 0x1c7   :  { %v230_v62 = vadd.f32 %v449_v61, %v366_v60  ;;  %v224_v63 = vpop.f32.mrb[1].mxu1 }
 0x1c8   :  { %v225_v0 = vadd.f32 %v366_v60, %v224_v63 }
 0x1c9   :  { %v234_v2 = vmax.f32 %v230_v62, 0.0 }
 0x1ca   :  { %v233_v1 = vmax.f32 %v225_v0, 0.0 }
 0x1cc   :  { %482 = vmatprep.mubr.f32.mxu0 %v233_v1 }
 0x1cd   :  { %483 = vmatmul.mubr.f32.vlgmr.msra.gmra.mrb[2].mxu0 %v234_v2 }
 0x2a0   :  { %v484_v4 = vpop.f32.mrb[2].mxu0 }
 0x2a1   :  { %v324_v5 = vpop.f32.mrb[3].mxu0  ;;  %v330_v7 = vadd.f32 %v484_v4, %v367_v3 }
 0x2a2   :  { %v325_v6 = vadd.f32 %v367_v3, %v324_v5 }
 0x2a3   :  { %v337_v9 = vsel %vm333_vm1, %v330_v7, -inf }
 0x2a4   :  { %v334_v8 = vsel %vm333_vm1, %v325_v6, -inf }
 0x2a5   :  { %335 = vmax.xlane.f32.xlu0 %v334_v8 }
 0x2a9   :  { %338 = vmax.xlane.f32.xlu0 %v337_v9 }
 0x332   :  { %v336_v10 = vpop.xlane.xlu0 %335 }
 0x333   :  { %v340_v11 = vsub.f32 %v325_v6, %v336_v10 }
 0x335   :  { %v342_v12 = vmul.f32 1.442695, %v340_v11 }
 0x336   :  { %v339_v13 = vpop.xlane.xlu0 %338 }
 0x337   :  { %556 = vpow2.f32 %v342_v12  ;;  %v341_v14 = vsub.f32 %v330_v7, %v339_v13 }
 0x339   :  { %v344_v15 = vmul.f32 1.442695, %v341_v14 }
 0x33b   :  { %558 = vpow2.f32 %v344_v15 }
 0x341   :  { %v557_v16 = vpop.eup %556 }
 0x342   :  { %v346_v17 = vsel %vm333_vm1, %v557_v16, 0.0 }
 0x343   :  { %347 = vadd.xlane.f32.xlu1 %v346_v17 }
 0x345   :  { %v559_v18 = vpop.eup %558 }
 0x346   :  { %v349_v19 = vsel %vm333_vm1, %v559_v18, 0.0 }
 0x347   :  { %350 = vadd.xlane.f32.xlu1 %v349_v19 }
 0x3d0   :  { %v348_v20 = vpop.xlane.xlu1 %347 }
 0x3d1   :  { %560 = vrcp.f32 %v348_v20 }
 0x3d4   :  { %v351_v21 = vpop.xlane.xlu1 %350 }
 0x3d5   :  { %562 = vrcp.f32 %v351_v21 }
 0x3db   :  { %v561_v22 = vpop.eup %560 }
 0x3dc   :  { %v354_v23 = vmul.f32 %v561_v22, %v557_v16 }
 0x3de   :  { %356 = vst.msk [vmem:[%s775_s7] sm:$0xff] %vm333_vm1, %v354_v23 }
 0x3df   :  { %v563_v24 = vpop.eup %562 }
 0x3e0   :  { %v355_v25 = vmul.f32 %v563_v24, %v559_v18 }
 0x3e2   :  { %357 = vst.msk [vmem:[%s775_s7 + $0x8] sm:$0xff] %vm333_vm1, %v355_v25 }
 0x3e3   :  { %362 = vsyncpa [#allocation3], 1 }

</bundles_post_ra>
